<compile_context>
chip_gen: v7x
topology: tpu7x:2x2x1
jax: 0.10.0
libtpu: 0.0.40
codegen_flags: <defaults>
</compile_context>

<pallas_src>
import jax
import jax.numpy as jnp
from jax.experimental import pallas as pl
from jax.experimental.pallas import tpu as pltpu


def _mlp_kernel(x_ref, w1_ref, b1_ref, w2_ref, b2_ref, w3_ref, b3_ref, o_ref):
    # fc1 + sigmoid (sigmoid lowers to EUP, a free slot next to the MXU work)
    h1 = jnp.dot(x_ref[...], w1_ref[...], preferred_element_type=jnp.float32)
    h1 = jax.nn.sigmoid(h1 + b1_ref[...])
    # fc2 + sigmoid
    h2 = jnp.dot(h1.astype(w2_ref.dtype), w2_ref[...],
                 preferred_element_type=jnp.float32)
    h2 = jax.nn.sigmoid(h2 + b2_ref[...])
    # fc3 + sigmoid
    h3 = jnp.dot(h2.astype(w3_ref.dtype), w3_ref[...],
                 preferred_element_type=jnp.float32)
    h3 = jax.nn.sigmoid(h3 + b3_ref[...])
    o_ref[...] = h3.astype(o_ref.dtype)


def _round_up(n, m):
    return ((n + m - 1) // m) * m


def _pick_tile(b, tile_m):
    """Pick (tm, b_pad): number of tiles fixed by tile_m, tm shrunk to the
    smallest multiple of 8 that covers B -> minimal padding waste."""
    n_tiles = max(1, pl.cdiv(b, tile_m))
    tm = _round_up(pl.cdiv(b, n_tiles), 8)
    return tm, tm * n_tiles


def reg_clas_nn_forward(x, params, *, tile_m=1024):
    """Fused forward pass of RegClasNN.

    x: (B, input_size) float32
    params: dict with w1 (in, h1), b1 (1, h1), w2 (h1, h2), b2 (1, h2),
            w3 (h2, out), b3 (1, out)
    """
    w1, b1 = params["w1"], params["b1"]
    w2, b2 = params["w2"], params["b2"]
    w3, b3 = params["w3"], params["b3"]

    B, in_size = x.shape
    out_size = w3.shape[1]

    tm, b_pad = _pick_tile(B, tile_m)
    if b_pad != B:
        x = jnp.pad(x, ((0, b_pad - B), (0, 0)))

    grid = (b_pad // tm,)

    # Weights/biases: constant index_map -> fetched once, resident in VMEM.
    const = lambda shape: pl.BlockSpec(shape, lambda i: tuple(0 for _ in shape))

    out = pl.pallas_call(
        _mlp_kernel,
        out_shape=jax.ShapeDtypeStruct((b_pad, out_size), jnp.float32),
        grid_spec=pl.GridSpec(
            grid=grid,
            in_specs=[
                pl.BlockSpec((tm, in_size), lambda i: (i, 0)),   # x: streamed
                const(w1.shape), const(b1.shape),
                const(w2.shape), const(b2.shape),
                const(w3.shape), const(b3.shape),
            ],
            out_specs=pl.BlockSpec((tm, out_size), lambda i: (i, 0)),
        ),
        compiler_params=pltpu.CompilerParams(
            dimension_semantics=("parallel",),  # shard batch tiles across v7x's 2 TCs
        ),
    )(x, w1, b1, w2, b2, w3, b3)

    if b_pad != B:
        out = out[:B]
    return out


def init_params(key, input_size, hidden_size1, hidden_size2, output_size):
    """Deterministic init mimicking nn.Linear's U(-1/sqrt(fan_in), 1/sqrt(fan_in))."""
    keys = jax.random.split(key, 6)

    def linear(kw, kb, fan_in, fan_out):
        bound = 1.0 / jnp.sqrt(jnp.float32(fan_in))
        w = jax.random.uniform(kw, (fan_in, fan_out), jnp.float32, -bound, bound)
        b = jax.random.uniform(kb, (1, fan_out), jnp.float32, -bound, bound)
        return w, b

    w1, b1 = linear(keys[0], keys[1], input_size, hidden_size1)
    w2, b2 = linear(keys[2], keys[3], hidden_size1, hidden_size2)
    w3, b3 = linear(keys[4], keys[5], hidden_size2, output_size)
    return {"w1": w1, "b1": b1, "w2": w2, "b2": b2, "w3": w3, "b3": b3}


if __name__ == "__main__":
    key = jax.random.PRNGKey(0)
    k_x, k_p, k_x2 = jax.random.split(key, 3)

    # Small shapes consistent with the module's constructor.
    batch = 8
    input_size = 32
    hidden_size1 = 64
    hidden_size2 = 32
    output_size = 8

    x = jax.random.normal(k_x, (batch, input_size), dtype=jnp.float32)
    params = init_params(k_p, input_size, hidden_size1, hidden_size2, output_size)

    out = reg_clas_nn_forward(x, params)
    out = jax.block_until_ready(out)

    # Pure-JAX reference for a sanity check.
    def ref(x, p):
        h = jax.nn.sigmoid(x @ p["w1"] + p["b1"])
        h = jax.nn.sigmoid(h @ p["w2"] + p["b2"])
        return jax.nn.sigmoid(h @ p["w3"] + p["b3"])

    expected = ref(x, params)
    assert out.shape == (batch, output_size)
    assert jnp.allclose(out, expected, atol=1e-5, rtol=1e-5)

    # Exercise the tiled / padded path (B not a multiple of the tile, > tile).
    big_batch = 2500
    x_big = jax.random.normal(k_x2, (big_batch, input_size), dtype=jnp.float32)
    out_big = jax.block_until_ready(reg_clas_nn_forward(x_big, params))
    assert out_big.shape == (big_batch, output_size)
    assert jnp.allclose(out_big, ref(x_big, params), atol=1e-5, rtol=1e-5)

    print("KERNEL_OK")
</pallas_src>

<mosaic_0001>
module attributes {stable_mosaic.version = 11 : i64} {
  func.func @_mlp_kernel(%arg0: i32, %arg1: memref<8x32xf32, #tpu.memory_space<vmem>>, %arg2: memref<32x64xf32, #tpu.memory_space<vmem>>, %arg3: memref<1x64xf32, #tpu.memory_space<vmem>>, %arg4: memref<64x32xf32, #tpu.memory_space<vmem>>, %arg5: memref<1x32xf32, #tpu.memory_space<vmem>>, %arg6: memref<32x8xf32, #tpu.memory_space<vmem>>, %arg7: memref<1x8xf32, #tpu.memory_space<vmem>>, %arg8: memref<8x8xf32, #tpu.memory_space<vmem>>) attributes {dimension_semantics = [#tpu.dimension_semantics<parallel>], iteration_bounds = array<i64: 1>, scalar_prefetch = 0 : i64, scratch_operands = 0 : i64, tpu.core_type = #tpu.core_type<tc>, window_params = [{transform_indices = @transform_0, window_bounds = array<i64: 8, 32>}, {pipeline_mode = #tpu.pipeline_mode<synchronous>, transform_indices = @transform_1, window_bounds = array<i64: 32, 64>}, {pipeline_mode = #tpu.pipeline_mode<synchronous>, transform_indices = @transform_2, window_bounds = array<i64: 1, 64>}, {pipeline_mode = #tpu.pipeline_mode<synchronous>, transform_indices = @transform_3, window_bounds = array<i64: 64, 32>}, {pipeline_mode = #tpu.pipeline_mode<synchronous>, transform_indices = @transform_4, window_bounds = array<i64: 1, 32>}, {pipeline_mode = #tpu.pipeline_mode<synchronous>, transform_indices = @transform_5, window_bounds = array<i64: 32, 8>}, {pipeline_mode = #tpu.pipeline_mode<synchronous>, transform_indices = @transform_6, window_bounds = array<i64: 1, 8>}, {transform_indices = @transform_7, window_bounds = array<i64: 8, 8>}]} {
    %c0 = arith.constant 0 : index
    %c0_0 = arith.constant 0 : index
    %0 = vector.load %arg1[%c0, %c0_0] : memref<8x32xf32, #tpu.memory_space<vmem>>, vector<8x32xf32>
    %c0_1 = arith.constant 0 : index
    %c0_2 = arith.constant 0 : index
    %1 = vector.load %arg2[%c0_1, %c0_2] : memref<32x64xf32, #tpu.memory_space<vmem>>, vector<32x64xf32>
    %cst = arith.constant dense<0.000000e+00> : vector<8x64xf32>
    %2 = tpu.matmul %0, %1, %cst {dimension_numbers = #tpu.dot_dimension_numbers<[1], [0], [0], [1], [0, 0, 1, 1], [], []>} : vector<8x32xf32>, vector<32x64xf32>, vector<8x64xf32> -> vector<8x64xf32>
    %c0_3 = arith.constant 0 : index
    %c0_4 = arith.constant 0 : index
    %3 = vector.load %arg3[%c0_3, %c0_4] : memref<1x64xf32, #tpu.memory_space<vmem>>, vector<1x64xf32>
    %4 = vector.broadcast %3 : vector<1x64xf32> to vector<8x64xf32>
    %5 = arith.addf %2, %4 : vector<8x64xf32>
    %6 = arith.negf %5 : vector<8x64xf32>
    %7 = math.exp %6 : vector<8x64xf32>
    %cst_5 = arith.constant 1.000000e+00 : f32
    %8 = vector.broadcast %cst_5 : f32 to vector<8x64xf32>
    %9 = arith.addf %8, %7 : vector<8x64xf32>
    %10 = arith.divf %8, %9 : vector<8x64xf32>
    %c0_6 = arith.constant 0 : index
    %c0_7 = arith.constant 0 : index
    %11 = vector.load %arg4[%c0_6, %c0_7] : memref<64x32xf32, #tpu.memory_space<vmem>>, vector<64x32xf32>
    %cst_8 = arith.constant dense<0.000000e+00> : vector<8x32xf32>
    %12 = tpu.matmul %10, %11, %cst_8 {dimension_numbers = #tpu.dot_dimension_numbers<[1], [0], [0], [1], [0, 0, 1, 1], [], []>} : vector<8x64xf32>, vector<64x32xf32>, vector<8x32xf32> -> vector<8x32xf32>
    %c0_9 = arith.constant 0 : index
    %c0_10 = arith.constant 0 : index
    %13 = vector.load %arg5[%c0_9, %c0_10] : memref<1x32xf32, #tpu.memory_space<vmem>>, vector<1x32xf32>
    %14 = vector.broadcast %13 : vector<1x32xf32> to vector<8x32xf32>
    %15 = arith.addf %12, %14 : vector<8x32xf32>
    %16 = arith.negf %15 : vector<8x32xf32>
    %17 = math.exp %16 : vector<8x32xf32>
    %cst_11 = arith.constant 1.000000e+00 : f32
    %18 = vector.broadcast %cst_11 : f32 to vector<8x32xf32>
    %19 = arith.addf %18, %17 : vector<8x32xf32>
    %20 = arith.divf %18, %19 : vector<8x32xf32>
    %c0_12 = arith.constant 0 : index
    %c0_13 = arith.constant 0 : index
    %21 = vector.load %arg6[%c0_12, %c0_13] : memref<32x8xf32, #tpu.memory_space<vmem>>, vector<32x8xf32>
    %cst_14 = arith.constant dense<0.000000e+00> : vector<8x8xf32>
    %22 = tpu.matmul %20, %21, %cst_14 {dimension_numbers = #tpu.dot_dimension_numbers<[1], [0], [0], [1], [0, 0, 1, 1], [], []>} : vector<8x32xf32>, vector<32x8xf32>, vector<8x8xf32> -> vector<8x8xf32>
    %c0_15 = arith.constant 0 : index
    %c0_16 = arith.constant 0 : index
    %23 = vector.load %arg7[%c0_15, %c0_16] : memref<1x8xf32, #tpu.memory_space<vmem>>, vector<1x8xf32>
    %24 = vector.broadcast %23 : vector<1x8xf32> to vector<8x8xf32>
    %25 = arith.addf %22, %24 : vector<8x8xf32>
    %26 = arith.negf %25 : vector<8x8xf32>
    %27 = math.exp %26 : vector<8x8xf32>
    %cst_17 = arith.constant 1.000000e+00 : f32
    %28 = vector.broadcast %cst_17 : f32 to vector<8x8xf32>
    %29 = arith.addf %28, %27 : vector<8x8xf32>
    %30 = arith.divf %28, %29 : vector<8x8xf32>
    %c0_18 = arith.constant 0 : index
    %c0_19 = arith.constant 0 : index
    %31 = vector.load %arg8[%c0_18, %c0_19] : memref<8x8xf32, #tpu.memory_space<vmem>>, vector<8x8xf32>
    tpu.vector_store %arg8[%c0_18, %c0_19], %30 {strides = array<i32>} : memref<8x8xf32, #tpu.memory_space<vmem>>, vector<8x8xf32>,
    return
  }
  func.func @transform_0(%arg0: i32) -> (i32, i32) {
    %c0_i32 = arith.constant 0 : i32
    %c0_i32_0 = arith.constant 0 : i32
    return %arg0, %c0_i32 : i32, i32
  }
  func.func @transform_1(%arg0: i32) -> (i32, i32) {
    %c0_i32 = arith.constant 0 : i32
    %c0_i32_0 = arith.constant 0 : i32
    %c0_i32_1 = arith.constant 0 : i32
    return %c0_i32, %c0_i32_0 : i32, i32
  }
  func.func @transform_2(%arg0: i32) -> (i32, i32) {
    %c0_i32 = arith.constant 0 : i32
    %c0_i32_0 = arith.constant 0 : i32
    %c0_i32_1 = arith.constant 0 : i32
    return %c0_i32, %c0_i32_0 : i32, i32
  }
  func.func @transform_3(%arg0: i32) -> (i32, i32) {
    %c0_i32 = arith.constant 0 : i32
    %c0_i32_0 = arith.constant 0 : i32
    %c0_i32_1 = arith.constant 0 : i32
    return %c0_i32, %c0_i32_0 : i32, i32
  }
  func.func @transform_4(%arg0: i32) -> (i32, i32) {
    %c0_i32 = arith.constant 0 : i32
    %c0_i32_0 = arith.constant 0 : i32
    %c0_i32_1 = arith.constant 0 : i32
    return %c0_i32, %c0_i32_0 : i32, i32
  }
  func.func @transform_5(%arg0: i32) -> (i32, i32) {
    %c0_i32 = arith.constant 0 : i32
    %c0_i32_0 = arith.constant 0 : i32
    %c0_i32_1 = arith.constant 0 : i32
    return %c0_i32, %c0_i32_0 : i32, i32
  }
  func.func @transform_6(%arg0: i32) -> (i32, i32) {
    %c0_i32 = arith.constant 0 : i32
    %c0_i32_0 = arith.constant 0 : i32
    %c0_i32_1 = arith.constant 0 : i32
    return %c0_i32, %c0_i32_0 : i32, i32
  }
  func.func @transform_7(%arg0: i32) -> (i32, i32) {
    %c0_i32 = arith.constant 0 : i32
    %c0_i32_0 = arith.constant 0 : i32
    return %arg0, %c0_i32 : i32, i32
  }
}

</mosaic_0001>

<bundles_post_ra>
// kernel: tpu_custom_call.1
= control target key start
LH: loop header
LB: loop body
LE: loop exit
PB: predicated region body
PF: predicated region fallthrough
CT: control target
= control target key end

     0   :  { %v453_v3 = vmov 0.0|0.0   ;;  %vm454_vm0 = vmmov 0   ;;  %v455_v6 = vmov 0.0   ;;  %s571_s0 = inlined_call_operand.vmem [shape: f32[8,32], index: 0, kind: input, shape index: {}]   ;;  %s572_s1 = inlined_call_operand.vmem [shape: f32[32,64], index: 1, kind: input, shape index: {}]   ;;  %s573_s2 = inlined_call_operand.vmem [shape: f32[1,64], index: 2, kind: input, shape index: {}]   ;;  %s574_s3 = inlined_call_operand.vmem [shape: f32[64,32], index: 3, kind: input, shape index: {}]   ;;  %s575_s4 = inlined_call_operand.vmem [shape: f32[1,32], index: 4, kind: input, shape index: {}]   ;;  %s576_s5 = inlined_call_operand.vmem [shape: f32[32,8], index: 5, kind: input, shape index: {}]   ;;  %s577_s6 = inlined_call_operand.vmem [shape: f32[1,8], index: 6, kind: input, shape index: {}]   ;;  %s578_s7 = inlined_call_operand.hbm [shape: f32[8,8], index: 7, kind: output, shape index: {}]  }
   0x1   :  { %v28_v0 = vld [vmem:[%s572_s1] sm:$0xff]  ;;  %v29_v1 = vld [vmem:[%s572_s1 + $0x8] sm:$0xff]  ;;  %v30_v2 = vld [vmem:[%s572_s1 + $0x10] sm:$0xff]  ;;  %389 = vmatprep.subr.bf16.mxu0 %v453_v3  ;;  %356 = vmatprep.mubr.msk.f32.mxu0 %vm454_vm0, %v455_v6 }
   0x2   :  { %v390_v4 = vpack.c.bf16 %v29_v1, %v28_v0  ;;  %v31_v5 = vld [vmem:[%s572_s1 + $0x18] sm:$0xff]  ;;  %395 = vmatprep.subr.bf16.mxu1 %v453_v3  ;;  %375 = vmatprep.mubr.msk.f32.mxu1 %vm454_vm0, %v455_v6 }
   0x3   :  { %12 = vsyncpa [#allocation3], 0  ;;  %v393_v7 = vpack.c.bf16 %v31_v5, %v30_v2  ;;  %v27_v8 = vld [vmem:[%s571_s0] sm:$0xff]  ;;  %vm39_vm1 = vcmask 261120   ;;  %v120_v10 = vld [vmem:[%s574_s3 + $0x8] sm:$0xff]  ;;  %vm134_vm2 = vcmask 523264  }
   0x4   :  { %391 = vmatpush3.bf16.msra.mxu0 %v390_v4  ;;  %v119_v9 = vld [vmem:[%s574_s3] sm:$0xff]  ;;  %v121_v12 = vld [vmem:[%s574_s3 + $0x10] sm:$0xff]  ;;  %v122_v13 = vld [vmem:[%s574_s3 + $0x18] sm:$0xff]  ;;  %vm304_vm3 = vcmask 64512  }
   0x5   :  { %392 = vmatprep.subr.bf16.mxu0 %v453_v3  ;;  %v396_v11 = vpack.c.bf16 %v120_v10, %v119_v9  ;;  %v399_v14 = vpack.c.bf16 %v122_v13, %v121_v12  ;;  %v123_v15 = vld [vmem:[%s574_s3 + $0x20] sm:$0xff]  ;;  %v124_v16 = vld [vmem:[%s574_s3 + $0x28] sm:$0xff]  ;;  %v125_v18 = vld [vmem:[%s574_s3 + $0x30] sm:$0xff] }
   0x6   :  { %v402_v17 = vpack.c.bf16 %v124_v16, %v123_v15  ;;  %v126_v19 = vld [vmem:[%s574_s3 + $0x38] sm:$0xff]  ;;  %v320_v21 = vld [vmem:[%s573_s2] ss:$0 sm:$0xff]  ;;  %v215_v30 = vld [vmem:[%s576_s5 + $0x8] sm:$0xff] }
   0x7   :  { %397 = vmatpush3.bf16.msra.mxu1 %v396_v11  ;;  %v405_v20 = vpack.c.bf16 %v126_v19, %v125_v18  ;;  %v214_v29 = vld [vmem:[%s576_s5] sm:$0xff]  ;;  %v216_v31 = vld [vmem:[%s576_s5 + $0x10] sm:$0xff]  ;;  %v217_v33 = vld [vmem:[%s576_s5 + $0x18] sm:$0xff] }
   0x8   :  { %394 = vmatpush3.bf16.msra.mxu0 %v393_v7  ;;  %398 = vmatprep.subr.bf16.mxu1 %v453_v3  ;;  %v408_v32 = vpack.c.bf16 %v215_v30, %v214_v29  ;;  %v411_v34 = vpack.c.bf16 %v217_v33, %v216_v31  ;;  %v323_v35 = vld [vmem:[%s575_s4] ss:$0 sm:$0xff]  ;;  %s456_s4 = smov [#allocation2]  }
   0x9   :  { %407 = vmatprep.subr.bf16.mxu0 %v453_v3  ;;  %v326_v43 = vld [vmem:[%s577_s6] ss:$0 sm:$0xff]  ;;  %s312_s12 = sshll.u32 %s456_s4, 4  ;;  %s313_s12 = int_to_ptr.vmem [resolvable:$true] %s312_s12 }
   0xa   :  { %s429_s13 = scalar_lea.vmem %s313_s12, 128  ;;  %p434_p1 = scmp.lt.s32.totalorder %s313_s12, %s313_s12 }
   0xb   :  { %357 = vmatmul.mubr.msk.f32.vlgmr.msra.gmra.mrb[0].mxu0 %vm39_vm1, %v27_v8  ;;  %400 = vmatpush3.bf16.msra.mxu1 %v399_v14  ;;  %p430_p0 = scmp.ne.s32.totalorder %s313_s12, %s429_s13  ;;  %p435_p2 = scmp.lt.s32.totalorder %s429_s13, %s429_s13 }
   0xc   :  { %386 = vmatprep.mubr.msk.f32.mxu0 %vm454_vm0, %v455_v6  ;;  %401 = vmatprep.subr.bf16.mxu1 %v453_v3 }
   0xd   :  { %409 = vmatpush3.bf16.msra.mxu0 %v408_v32  ;;  %p436_p3 = por %p435_p2, %p434_p1 }
   0xe   :  { %410 = vmatprep.subr.bf16.mxu0 %v453_v3 }
   0xf   :  { %403 = vmatpush3.bf16.msra.mxu1 %v402_v17  ;;  %p437_p4 = pnand %p436_p3, %p430_p0 }
  0x10   :  { %404 = vmatprep.subr.bf16.mxu1 %v453_v3 }
  0x11   :  { %412 = vmatpush3.bf16.msra.mxu0 %v411_v34 }
  0x13   :  { %406 = vmatpush3.bf16.msra.mxu1 %v405_v20 }
  0xde   :  { %v109_v22 = vpop.f32.mrb[0].mxu0 }
  0xdf   :  { %v110_v23 = vadd.f32 %v320_v21, %v109_v22  ;;  %v358_v24 = vpop.f32.mrb[1].mxu0 }
  0xe1   :  { %v322_v25 = vmul.f32 -1.442695, %v110_v23 }
  0xe3   :  { %417 = vpow2.f32 %v322_v25 }
  0xed   :  { %v418_v26 = vpop.eup %417 }
  0xee   :  { %v116_v27 = vadd.f32 1.0, %v418_v26 }
  0xf0   :  { %419 = vrcp.f32 %v116_v27 }
  0xfa   :  { %v420_v28 = vpop.eup %419 }
  0xfb   :  { %376 = vmatmul.mubr.msk.f32.vlgmr.msra.gmra.mrb[0].mxu1 %vm134_vm2, %v420_v28 }
 0x1ce   :  { %v204_v36 = vpop.f32.mrb[0].mxu1 }
 0x1cf   :  { %v205_v37 = vadd.f32 %v323_v35, %v204_v36  ;;  %v377_v38 = vpop.f32.mrb[1].mxu1 }
 0x1d1   :  { %v325_v39 = vmul.f32 -1.442695, %v205_v37 }
 0x1d3   :  { %421 = vpow2.f32 %v325_v39 }
 0x1dd   :  { %v422_v40 = vpop.eup %421 }
 0x1de   :  { %v211_v41 = vadd.f32 1.0, %v422_v40 }
 0x1e0   :  { %423 = vrcp.f32 %v211_v41 }
 0x1ea   :  { %v424_v42 = vpop.eup %423 }
 0x1eb   :  { %387 = vmatmul.mubr.msk.f32.vlgmr.msra.gmra.mrb[2].mxu0 %vm39_vm1, %v424_v42 }
 0x2be   :  { %v294_v44 = vpop.f32.mrb[2].mxu0 }
 0x2bf   :  { %v295_v45 = vadd.f32 %v326_v43, %v294_v44  ;;  %v388_v46 = vpop.f32.mrb[3].mxu0 }
 0x2c1   :  { %v328_v47 = vmul.f32 -1.442695, %v295_v45 }
 0x2c3   :  { %425 = vpow2.f32 %v328_v47 }
 0x2cd   :  { %v426_v48 = vpop.eup %425 }
 0x2ce   :  { %v301_v49 = vadd.f32 1.0, %v426_v48 }
 0x2d0   :  { %427 = vrcp.f32 %v301_v49 }
 0x2da   :  { %v428_v50 = vpop.eup %427 }
 0x2db   :  { %305 = vst.msk [vmem:[#allocation2] sm:$0xff] %vm304_vm3, %v428_v50 }
 0x2dc   :  { %440 = shalt.err (!%p437_p4)
}
 0x2dd   :  { %s441_s15 = scalar_lea.hbm %s578_s7, 128 }
 0x2de   :  { %p442_p5 = scmp.ne.s32.totalorder %s578_s7, %s441_s15  ;;  %p445_p6 = scmp.lt.u32.totalorder %s441_s15, %s578_s7 }
 0x2e0   :  { %p447_p7 = pnand %p445_p6, %p442_p5 }
 0x2e2   :  { %450 = shalt.err (!%p447_p7)
}
 0x2e3   :  { %315 = dma.vmem_to_hbm [thread:$0]  %s313_s12, 128, %s578_s7, [#allocation3]  }
 0x2e4   :  { %451 = dma.done.wait [#allocation3], 128  }
 0x2e5   :  { %452 = vsyncadd [#allocation3], 4294967168 }
 0x2e6   :  { %319 = vsyncpa [#allocation3], 1 }

</bundles_post_ra>
